<compile_context>
chip_gen: v7x
topology: tpu7x:2x2x1
jax: 0.10.0
libtpu: 0.0.40
codegen_flags: <defaults>
</compile_context>

<pallas_src>
import functools

import jax
import jax.numpy as jnp
import numpy as np
from jax import lax
from jax.experimental import pallas as pl
from jax.experimental.pallas import tpu as pltpu

# --- MultiScale default hyper-parameters (LiteFlowNet, Hui 2018) ----------
DIV_FLOW = 0.05
START_SCALE = 2
NUM_SCALES = 7 - START_SCALE                       # = 5
LOSS_WEIGHTS = (0.32, 0.08, 0.02, 0.01, 0.005)     # coarsest-first, matches output[0..4]
# AvgPool kernel/stride per pyramid level (coarsest first): 32, 16, 8, 4, 2
POOL_KERNELS = tuple(START_SCALE * 2 ** s for s in reversed(range(NUM_SCALES)))


# --------------------------- fused Pallas kernel ----------------------------
def _multiscale_kernel(*refs, C, level_dims, weights, pred_row_offs):
    """One batch element per grid step.

    refs (has_tail == len(level_dims) > 1):
        p0_ref   : (2W, W/2)   level-0 2x2 pool matrix, div_flow folded in   [resident]
        rall_ref : (W/2, Ct)   concatenated column-pool matrices for tail    [resident]
        lall_ref : (Rt, C*H/2) stacked row-pool matrices for tail            [resident]
        tgt_ref  : (1, C, H/2, 2W) lane-dense full-res target for this batch element
        pred_ref : (1, ROWS, W/2)  all prediction levels packed row-wise
        out_ref  : (1, 8, 128) loss splat in sublanes 0-3, EPE in 4-7
    """
    num_scales = len(level_dims)
    has_tail = num_scales > 1
    if has_tail:
        p0_ref, rall_ref, lall_ref, tgt_ref, pred_ref, out_ref = refs
    else:
        p0_ref, tgt_ref, pred_ref, out_ref = refs

    _, _, H2, W2x2 = tgt_ref.shape
    tot_rows, W2 = pred_ref.shape[1], pred_ref.shape[2]

    # Lane-dense full-resolution slab (C*H/2, 2W): leading-dim merge only.
    slab = tgt_ref[...].astype(jnp.float32).reshape(C * H2, W2x2)

    # Level-0 pool (2x2 AvgPool with div_flow folded) as ONE full-width MXU matmul.
    pooled0 = jnp.dot(slab, p0_ref[...], preferred_element_type=jnp.float32)  # (C*H2, W2)

    # All prediction levels in one slab (single DMA stream).
    pred = pred_ref[...].astype(jnp.float32).reshape(tot_rows, W2)

    loss_acc = jnp.float32(0.0)
    epe_acc = jnp.float32(0.0)

    def accum(d, h, w, wgt, loss_acc, epe_acc):
        # L1 term: mean over (C, h, w).
        l1 = jnp.sum(jnp.abs(d)) * (1.0 / (C * h * w))
        # EPE term: 2-norm over channel, mean over (h, w).  Leading-dim split reshape
        # (no sub-(8,128) sublane slices at coarse levels).
        d3 = d.reshape(C, h, w)
        sq = jnp.sum(d3 * d3, axis=0)
        epe = jnp.sum(jnp.sqrt(sq)) * (1.0 / (h * w))
        return (loss_acc + jnp.float32(wgt) * l1,
                epe_acc + jnp.float32(wgt) * epe)

    # ---- level 0 (finest) ----
    h0, w0 = level_dims[0]
    d0 = pred[pred_row_offs[0]:pred_row_offs[0] + C * h0, 0:w0] - pooled0
    loss_acc, epe_acc = accum(d0, h0, w0, weights[0], loss_acc, epe_acc)

    # ---- coarse tail: all remaining levels from TWO matmuls ----
    if has_tail:
        z = jnp.dot(pooled0, rall_ref[...], preferred_element_type=jnp.float32)
        ptail = jnp.dot(lall_ref[...], z, preferred_element_type=jnp.float32)
        roff = 0
        coff = 0
        for s in range(1, num_scales):
            h, w = level_dims[s]
            t_blk = ptail[roff:roff + C * h, coff:coff + w]
            p_blk = pred[pred_row_offs[s]:pred_row_offs[s] + C * h, 0:w]
            loss_acc, epe_acc = accum(p_blk - t_blk, h, w, weights[s],
                                      loss_acc, epe_acc)
            roff += C * h
            coff += w

    # Single merged output block: loss in sublanes 0-3, EPE in 4-7 (unmasked store).
    row = lax.broadcasted_iota(jnp.int32, out_ref.shape, 1)
    out_ref[...] = jnp.where(row < 4, loss_acc, epe_acc)


# --------------------------- wrapper / pallas_call ---------------------------
def _fused_multiscale_loss(target, flows_fine_first, weights_fine_first, div_flow):
    """Single pallas_call over all pyramid levels, gridded over the batch dim."""
    B, C, H, W = target.shape
    num_scales = len(flows_fine_first)
    level_dims = tuple((H >> (s + 1), W >> (s + 1)) for s in range(num_scales))
    for s, f in enumerate(flows_fine_first):
        assert f.shape == (B, C) + level_dims[s], (
            "pyramid level shapes must halve at every level (finest first)")

    H2, W2 = H // 2, W // 2

    # Lane-dense target view: free metadata reshape of contiguous NCHW.
    tgt2 = target.reshape(B, C, H2, 2 * W)

    # ---- host-side pool matrices (trace-time constants, DMA'd once, kept resident) ----
    # Level-0: (2W, W/2), P0[l, i] = 0.25 * div_flow  iff  (l % W)//2 == i.
    lidx = np.arange(2 * W)
    p0 = np.zeros((2 * W, W2), np.float32)
    p0[lidx, (lidx % W) // 2] = 0.25 * float(div_flow)

    mats = [jnp.asarray(p0)]
    mat_specs = [pl.BlockSpec(p0.shape, lambda b: (0, 0))]

    has_tail = num_scales > 1
    if has_tail:
        tail_hs = [level_dims[s][0] for s in range(1, num_scales)]
        tail_ws = [level_dims[s][1] for s in range(1, num_scales)]

        # R_all = [R_2 | R_4 | ...]:  (W/2, sum(tail widths)), column pooling.
        r_all = np.zeros((W2, sum(tail_ws)), np.float32)
        j = np.arange(W2)
        coff = 0
        for s in range(1, num_scales):
            k = 1 << s
            r_all[j, coff + j // k] = 1.0 / k
            coff += level_dims[s][1]

        # L_all = [L_2; L_4; ...]:  (sum(C*tail heights), C*H/2), row pooling.
        # H/2 divisible by every k, so "j//k" never mixes channels (== kron(I_C, pool_k)).
        l_all = np.zeros((C * sum(tail_hs), C * H2), np.float32)
        jj = np.arange(C * H2)
        roff = 0
        for s in range(1, num_scales):
            k = 1 << s
            l_all[roff + jj // k, jj] = 1.0 / k
            roff += C * level_dims[s][0]

        mats += [jnp.asarray(r_all), jnp.asarray(l_all)]
        mat_specs += [pl.BlockSpec(r_all.shape, lambda b: (0, 0)),
                      pl.BlockSpec(l_all.shape, lambda b: (0, 0))]

    # ---- pack all prediction levels into ONE (B, rows, W/2) slab (single DMA) ----
    slabs = []
    pred_row_offs = []
    roff = 0
    for s, f in enumerate(flows_fine_first):
        h, w = level_dims[s]
        slab = f.reshape(B, C * h, w)          # leading-dim merge: free
        if w < W2:
            slab = jnp.pad(slab, ((0, 0), (0, 0), (0, W2 - w)))
        slabs.append(slab)
        pred_row_offs.append(roff)
        roff += C * h                          # offsets are multiples of 8 (C*h >= 4, desc.)
    pred_packed = jnp.concatenate(slabs, axis=1) if len(slabs) > 1 else slabs[0]
    tot_rows = roff

    kernel = functools.partial(
        _multiscale_kernel,
        C=C,
        level_dims=level_dims,
        weights=tuple(float(x) for x in weights_fine_first),
        pred_row_offs=tuple(pred_row_offs))

    in_specs = mat_specs + [
        pl.BlockSpec((1, C, H2, 2 * W), lambda b: (b, 0, 0, 0)),
        pl.BlockSpec((1, tot_rows, W2), lambda b: (b, 0, 0)),
    ]
    out_specs = pl.BlockSpec((1, 8, 128), lambda b: (b, 0, 0))
    out_shape = jax.ShapeDtypeStruct((B, 8, 128), jnp.float32)

    out = pl.pallas_call(
        kernel,
        grid=(B,),
        in_specs=in_specs,
        out_specs=out_specs,
        out_shape=out_shape,
        compiler_params=pltpu.CompilerParams(
            dimension_semantics=("parallel",)),   # batch elements independent (v7x 2 TCs)
    )(*mats, tgt2, pred_packed)

    inv_b = 1.0 / B
    return jnp.sum(out[:, 0, 0]) * inv_b, jnp.sum(out[:, 4, 0]) * inv_b


# --------------------------- MultiScale.forward ----------------------------
@jax.jit
def multiscale_forward(output, target):
    """Mirrors MultiScale.forward for the default config (norm='L1', use_mean=True).

    output : list of 5 NCHW flow pyramids (coarsest first) OR a single tensor.
    target : NCHW full-resolution target flow.
    Returns [lossvalue, epevalue].
    """
    if isinstance(output, (tuple, list)):
        assert len(LOSS_WEIGHTS) == len(output)
        # TODO(synk): nested per-scale prediction lists (output_ itself a list) are not handled.
        flows_fine_first = tuple(reversed(list(output)))
        weights_fine_first = tuple(reversed(LOSS_WEIGHTS))
        lossvalue, epevalue = _fused_multiscale_loss(
            target, flows_fine_first, weights_fine_first, DIV_FLOW)
        return [lossvalue, epevalue]
    else:
        # PyTorch else-branch: pool target with the finest AvgPool(2, 2); no div_flow,
        # no per-scale weighting.
        lossvalue, epevalue = _fused_multiscale_loss(target, (output,), (1.0,), 1.0)
        return [lossvalue, epevalue]


# --------------------------- pure-JAX references -----------------------------
def _reference_list(outputs, target):
    t = DIV_FLOW * target
    l1_tot, epe_tot = 0.0, 0.0
    for i, o in enumerate(outputs):
        k = POOL_KERNELS[i]
        B, C, H, W = t.shape
        tp = t.reshape(B, C, H // k, k, W // k, k).mean(axis=(3, 5))
        d = o - tp
        l1_tot += LOSS_WEIGHTS[i] * jnp.mean(jnp.abs(d))
        epe_tot += LOSS_WEIGHTS[i] * jnp.mean(jnp.sqrt(jnp.sum(d * d, axis=1)))
    return l1_tot, epe_tot


def _reference_single(output, target):
    B, C, H, W = target.shape
    tp = target.reshape(B, C, H // 2, 2, W // 2, 2).mean(axis=(3, 5))
    d = output - tp
    return jnp.mean(jnp.abs(d)), jnp.mean(jnp.sqrt(jnp.sum(d * d, axis=1)))


# ------------------------------- main --------------------------------------
if __name__ == "__main__":
    key = jax.random.PRNGKey(0)
    B, C = 2, 2                       # optical flow: 2 channels
    H = W = 64                        # divisible by the largest pool kernel (32)

    key, tk = jax.random.split(key)
    target = jax.random.normal(tk, (B, C, H, W), dtype=jnp.float32)

    outputs = []
    for k_pool in POOL_KERNELS:       # coarsest first, like the PyTorch module
        key, ok = jax.random.split(key)
        outputs.append(
            jax.random.normal(ok, (B, C, H // k_pool, W // k_pool), dtype=jnp.float32))

    # --- list branch (standard pyramid loss) ---
    lossvalue, epevalue = multiscale_forward(outputs, target)
    lossvalue = jax.block_until_ready(lossvalue)
    epevalue = jax.block_until_ready(epevalue)

    ref_l1, ref_epe = _reference_list(outputs, target)
    np.testing.assert_allclose(np.asarray(lossvalue), np.asarray(ref_l1),
                               rtol=1e-4, atol=1e-5)
    np.testing.assert_allclose(np.asarray(epevalue), np.asarray(ref_epe),
                               rtol=1e-4, atol=1e-5)

    # --- single-tensor branch (finest pool, no div_flow, no weights) ---
    key, sk = jax.random.split(key)
    single = jax.random.normal(sk, (B, C, H // 2, W // 2), dtype=jnp.float32)
    l1_s, epe_s = multiscale_forward(single, target)
    l1_s = jax.block_until_ready(l1_s)
    epe_s = jax.block_until_ready(epe_s)
    ref_l1s, ref_epes = _reference_single(single, target)
    np.testing.assert_allclose(np.asarray(l1_s), np.asarray(ref_l1s),
                               rtol=1e-4, atol=1e-5)
    np.testing.assert_allclose(np.asarray(epe_s), np.asarray(ref_epes),
                               rtol=1e-4, atol=1e-5)

    print("KERNEL_OK")
</pallas_src>

<mosaic_0001>
module attributes {stable_mosaic.version = 11 : i64} {
  func.func @_multiscale_kernel(%arg0: i32, %arg1: memref<128x32xf32, #tpu.memory_space<vmem>>, %arg2: memref<32x30xf32, #tpu.memory_space<vmem>>, %arg3: memref<60x64xf32, #tpu.memory_space<vmem>>, %arg4: memref<1x2x32x128xf32, #tpu.memory_space<vmem>>, %arg5: memref<1x124x32xf32, #tpu.memory_space<vmem>>, %arg6: memref<1x8x128xf32, #tpu.memory_space<vmem>>) attributes {dimension_semantics = [#tpu.dimension_semantics<parallel>], iteration_bounds = array<i64: 2>, scalar_prefetch = 0 : i64, scratch_operands = 0 : i64, tpu.core_type = #tpu.core_type<tc>, window_params = [{pipeline_mode = #tpu.pipeline_mode<synchronous>, transform_indices = @transform_0, window_bounds = array<i64: 128, 32>}, {pipeline_mode = #tpu.pipeline_mode<synchronous>, transform_indices = @transform_1, window_bounds = array<i64: 32, 30>}, {pipeline_mode = #tpu.pipeline_mode<synchronous>, transform_indices = @transform_2, window_bounds = array<i64: 60, 64>}, {transform_indices = @transform_3, window_bounds = array<i64: 1, 2, 32, 128>}, {transform_indices = @transform_4, window_bounds = array<i64: 1, 124, 32>}, {transform_indices = @transform_5, window_bounds = array<i64: 1, 8, 128>}]} {
    %c0 = arith.constant 0 : index
    %c0_0 = arith.constant 0 : index
    %c0_1 = arith.constant 0 : index
    %c0_2 = arith.constant 0 : index
    %0 = vector.load %arg4[%c0, %c0_0, %c0_1, %c0_2] : memref<1x2x32x128xf32, #tpu.memory_space<vmem>>, vector<1x2x32x128xf32>
    %1 = vector.shape_cast %0 : vector<1x2x32x128xf32> to vector<64x128xf32>
    %c0_3 = arith.constant 0 : index
    %c0_4 = arith.constant 0 : index
    %2 = vector.load %arg1[%c0_3, %c0_4] : memref<128x32xf32, #tpu.memory_space<vmem>>, vector<128x32xf32>
    %cst = arith.constant dense<0.000000e+00> : vector<64x32xf32>
    %3 = tpu.matmul %1, %2, %cst {dimension_numbers = #tpu.dot_dimension_numbers<[1], [0], [0], [1], [0, 0, 1, 1], [], []>} : vector<64x128xf32>, vector<128x32xf32>, vector<64x32xf32> -> vector<64x32xf32>
    %c0_5 = arith.constant 0 : index
    %c0_6 = arith.constant 0 : index
    %c0_7 = arith.constant 0 : index
    %4 = vector.load %arg5[%c0_5, %c0_6, %c0_7] : memref<1x124x32xf32, #tpu.memory_space<vmem>>, vector<1x124x32xf32>
    %5 = vector.shape_cast %4 : vector<1x124x32xf32> to vector<124x32xf32>
    %6 = vector.extract_strided_slice %5 {offsets = [0, 0], sizes = [64, 32], strides = [1, 1]} : vector<124x32xf32> to vector<64x32xf32>
    %7 = arith.subf %6, %3 : vector<64x32xf32>
    %8 = math.absf %7 : vector<64x32xf32>
    %9 = vector.shape_cast %8 : vector<64x32xf32> to vector<1x64x32xf32>
    %cst_8 = arith.constant dense<0.000000e+00> : vector<1xf32>
    %10 = vector.multi_reduction <add>, %9, %cst_8 [1, 2] : vector<1x64x32xf32> to vector<1xf32>
    %11 = vector.shape_cast %10 : vector<1xf32> to vector<1x1x1xf32>
    %12 = vector.extract %11[0, 0, 0] : f32 from vector<1x1x1xf32>
    %cst_9 = arith.constant 4.8828125E-4 : f32
    %13 = arith.mulf %12, %cst_9 : f32
    %14 = vector.shape_cast %7 : vector<64x32xf32> to vector<2x32x32xf32>
    %15 = arith.mulf %14, %14 : vector<2x32x32xf32>
    %cst_10 = arith.constant dense<0.000000e+00> : vector<32x32xf32>
    %16 = vector.multi_reduction <add>, %15, %cst_10 [0] : vector<2x32x32xf32> to vector<32x32xf32>
    %17 = math.sqrt %16 : vector<32x32xf32>
    %18 = vector.shape_cast %17 : vector<32x32xf32> to vector<1x32x32xf32>
    %cst_11 = arith.constant dense<0.000000e+00> : vector<1xf32>
    %19 = vector.multi_reduction <add>, %18, %cst_11 [1, 2] : vector<1x32x32xf32> to vector<1xf32>
    %20 = vector.shape_cast %19 : vector<1xf32> to vector<1x1x1xf32>
    %21 = vector.extract %20[0, 0, 0] : f32 from vector<1x1x1xf32>
    %cst_12 = arith.constant 9.765625E-4 : f32
    %22 = arith.mulf %21, %cst_12 : f32
    %cst_13 = arith.constant 5.000000e-03 : f32
    %23 = arith.mulf %cst_13, %13 : f32
    %cst_14 = arith.constant 0.000000e+00 : f32
    %24 = arith.addf %cst_14, %23 : f32
    %cst_15 = arith.constant 5.000000e-03 : f32
    %25 = arith.mulf %cst_15, %22 : f32
    %cst_16 = arith.constant 0.000000e+00 : f32
    %26 = arith.addf %cst_16, %25 : f32
    %c0_17 = arith.constant 0 : index
    %c0_18 = arith.constant 0 : index
    %27 = vector.load %arg2[%c0_17, %c0_18] : memref<32x30xf32, #tpu.memory_space<vmem>>, vector<32x30xf32>
    %cst_19 = arith.constant dense<0.000000e+00> : vector<64x30xf32>
    %28 = tpu.matmul %3, %27, %cst_19 {dimension_numbers = #tpu.dot_dimension_numbers<[1], [0], [0], [1], [0, 0, 1, 1], [], []>} : vector<64x32xf32>, vector<32x30xf32>, vector<64x30xf32> -> vector<64x30xf32>
    %c0_20 = arith.constant 0 : index
    %c0_21 = arith.constant 0 : index
    %29 = vector.load %arg3[%c0_20, %c0_21] : memref<60x64xf32, #tpu.memory_space<vmem>>, vector<60x64xf32>
    %cst_22 = arith.constant dense<0.000000e+00> : vector<60x30xf32>
    %30 = tpu.matmul %29, %28, %cst_22 {dimension_numbers = #tpu.dot_dimension_numbers<[1], [0], [0], [1], [0, 0, 1, 1], [], []>} : vector<60x64xf32>, vector<64x30xf32>, vector<60x30xf32> -> vector<60x30xf32>
    %31 = vector.extract_strided_slice %30 {offsets = [0, 0], sizes = [32, 16], strides = [1, 1]} : vector<60x30xf32> to vector<32x16xf32>
    %32 = vector.extract_strided_slice %5 {offsets = [64, 0], sizes = [32, 16], strides = [1, 1]} : vector<124x32xf32> to vector<32x16xf32>
    %33 = arith.subf %32, %31 : vector<32x16xf32>
    %34 = math.absf %33 : vector<32x16xf32>
    %35 = vector.shape_cast %34 : vector<32x16xf32> to vector<1x32x16xf32>
    %cst_23 = arith.constant dense<0.000000e+00> : vector<1xf32>
    %36 = vector.multi_reduction <add>, %35, %cst_23 [1, 2] : vector<1x32x16xf32> to vector<1xf32>
    %37 = vector.shape_cast %36 : vector<1xf32> to vector<1x1x1xf32>
    %38 = vector.extract %37[0, 0, 0] : f32 from vector<1x1x1xf32>
    %cst_24 = arith.constant 0.001953125 : f32
    %39 = arith.mulf %38, %cst_24 : f32
    %40 = vector.shape_cast %33 : vector<32x16xf32> to vector<2x16x16xf32>
    %41 = arith.mulf %40, %40 : vector<2x16x16xf32>
    %cst_25 = arith.constant dense<0.000000e+00> : vector<16x16xf32>
    %42 = vector.multi_reduction <add>, %41, %cst_25 [0] : vector<2x16x16xf32> to vector<16x16xf32>
    %43 = math.sqrt %42 : vector<16x16xf32>
    %44 = vector.shape_cast %43 : vector<16x16xf32> to vector<1x16x16xf32>
    %cst_26 = arith.constant dense<0.000000e+00> : vector<1xf32>
    %45 = vector.multi_reduction <add>, %44, %cst_26 [1, 2] : vector<1x16x16xf32> to vector<1xf32>
    %46 = vector.shape_cast %45 : vector<1xf32> to vector<1x1x1xf32>
    %47 = vector.extract %46[0, 0, 0] : f32 from vector<1x1x1xf32>
    %cst_27 = arith.constant 3.906250e-03 : f32
    %48 = arith.mulf %47, %cst_27 : f32
    %cst_28 = arith.constant 0.00999999977 : f32
    %49 = arith.mulf %cst_28, %39 : f32
    %50 = arith.addf %24, %49 : f32
    %cst_29 = arith.constant 0.00999999977 : f32
    %51 = arith.mulf %cst_29, %48 : f32
    %52 = arith.addf %26, %51 : f32
    %53 = vector.extract_strided_slice %30 {offsets = [32, 16], sizes = [16, 8], strides = [1, 1]} : vector<60x30xf32> to vector<16x8xf32>
    %54 = vector.extract_strided_slice %5 {offsets = [96, 0], sizes = [16, 8], strides = [1, 1]} : vector<124x32xf32> to vector<16x8xf32>
    %55 = arith.subf %54, %53 : vector<16x8xf32>
    %56 = math.absf %55 : vector<16x8xf32>
    %57 = vector.shape_cast %56 : vector<16x8xf32> to vector<1x16x8xf32>
    %cst_30 = arith.constant dense<0.000000e+00> : vector<1xf32>
    %58 = vector.multi_reduction <add>, %57, %cst_30 [1, 2] : vector<1x16x8xf32> to vector<1xf32>
    %59 = vector.shape_cast %58 : vector<1xf32> to vector<1x1x1xf32>
    %60 = vector.extract %59[0, 0, 0] : f32 from vector<1x1x1xf32>
    %cst_31 = arith.constant 7.812500e-03 : f32
    %61 = arith.mulf %60, %cst_31 : f32
    %62 = vector.shape_cast %55 : vector<16x8xf32> to vector<2x8x8xf32>
    %63 = arith.mulf %62, %62 : vector<2x8x8xf32>
    %cst_32 = arith.constant dense<0.000000e+00> : vector<8x8xf32>
    %64 = vector.multi_reduction <add>, %63, %cst_32 [0] : vector<2x8x8xf32> to vector<8x8xf32>
    %65 = math.sqrt %64 : vector<8x8xf32>
    %66 = vector.shape_cast %65 : vector<8x8xf32> to vector<1x8x8xf32>
    %cst_33 = arith.constant dense<0.000000e+00> : vector<1xf32>
    %67 = vector.multi_reduction <add>, %66, %cst_33 [1, 2] : vector<1x8x8xf32> to vector<1xf32>
    %68 = vector.shape_cast %67 : vector<1xf32> to vector<1x1x1xf32>
    %69 = vector.extract %68[0, 0, 0] : f32 from vector<1x1x1xf32>
    %cst_34 = arith.constant 1.562500e-02 : f32
    %70 = arith.mulf %69, %cst_34 : f32
    %cst_35 = arith.constant 2.000000e-02 : f32
    %71 = arith.mulf %cst_35, %61 : f32
    %72 = arith.addf %50, %71 : f32
    %cst_36 = arith.constant 2.000000e-02 : f32
    %73 = arith.mulf %cst_36, %70 : f32
    %74 = arith.addf %52, %73 : f32
    %75 = vector.extract_strided_slice %30 {offsets = [48, 24], sizes = [8, 4], strides = [1, 1]} : vector<60x30xf32> to vector<8x4xf32>
    %76 = vector.extract_strided_slice %5 {offsets = [112, 0], sizes = [8, 4], strides = [1, 1]} : vector<124x32xf32> to vector<8x4xf32>
    %77 = arith.subf %76, %75 : vector<8x4xf32>
    %78 = math.absf %77 : vector<8x4xf32>
    %79 = vector.shape_cast %78 : vector<8x4xf32> to vector<1x8x4xf32>
    %cst_37 = arith.constant dense<0.000000e+00> : vector<1xf32>
    %80 = vector.multi_reduction <add>, %79, %cst_37 [1, 2] : vector<1x8x4xf32> to vector<1xf32>
    %81 = vector.shape_cast %80 : vector<1xf32> to vector<1x1x1xf32>
    %82 = vector.extract %81[0, 0, 0] : f32 from vector<1x1x1xf32>
    %cst_38 = arith.constant 3.125000e-02 : f32
    %83 = arith.mulf %82, %cst_38 : f32
    %84 = vector.shape_cast %77 : vector<8x4xf32> to vector<2x4x4xf32>
    %85 = arith.mulf %84, %84 : vector<2x4x4xf32>
    %cst_39 = arith.constant dense<0.000000e+00> : vector<4x4xf32>
    %86 = vector.multi_reduction <add>, %85, %cst_39 [0] : vector<2x4x4xf32> to vector<4x4xf32>
    %87 = math.sqrt %86 : vector<4x4xf32>
    %88 = vector.shape_cast %87 : vector<4x4xf32> to vector<1x4x4xf32>
    %cst_40 = arith.constant dense<0.000000e+00> : vector<1xf32>
    %89 = vector.multi_reduction <add>, %88, %cst_40 [1, 2] : vector<1x4x4xf32> to vector<1xf32>
    %90 = vector.shape_cast %89 : vector<1xf32> to vector<1x1x1xf32>
    %91 = vector.extract %90[0, 0, 0] : f32 from vector<1x1x1xf32>
    %cst_41 = arith.constant 6.250000e-02 : f32
    %92 = arith.mulf %91, %cst_41 : f32
    %cst_42 = arith.constant 8.000000e-02 : f32
    %93 = arith.mulf %cst_42, %83 : f32
    %94 = arith.addf %72, %93 : f32
    %cst_43 = arith.constant 8.000000e-02 : f32
    %95 = arith.mulf %cst_43, %92 : f32
    %96 = arith.addf %74, %95 : f32
    %97 = vector.extract_strided_slice %30 {offsets = [56, 28], sizes = [4, 2], strides = [1, 1]} : vector<60x30xf32> to vector<4x2xf32>
    %98 = vector.extract_strided_slice %5 {offsets = [120, 0], sizes = [4, 2], strides = [1, 1]} : vector<124x32xf32> to vector<4x2xf32>
    %99 = arith.subf %98, %97 : vector<4x2xf32>
    %100 = math.absf %99 : vector<4x2xf32>
    %101 = vector.shape_cast %100 : vector<4x2xf32> to vector<1x4x2xf32>
    %cst_44 = arith.constant dense<0.000000e+00> : vector<1xf32>
    %102 = vector.multi_reduction <add>, %101, %cst_44 [1, 2] : vector<1x4x2xf32> to vector<1xf32>
    %103 = vector.shape_cast %102 : vector<1xf32> to vector<1x1x1xf32>
    %104 = vector.extract %103[0, 0, 0] : f32 from vector<1x1x1xf32>
    %cst_45 = arith.constant 1.250000e-01 : f32
    %105 = arith.mulf %104, %cst_45 : f32
    %106 = vector.shape_cast %99 : vector<4x2xf32> to vector<2x2x2xf32>
    %107 = arith.mulf %106, %106 : vector<2x2x2xf32>
    %cst_46 = arith.constant dense<0.000000e+00> : vector<2x2xf32>
    %108 = vector.multi_reduction <add>, %107, %cst_46 [0] : vector<2x2x2xf32> to vector<2x2xf32>
    %109 = math.sqrt %108 : vector<2x2xf32>
    %110 = vector.shape_cast %109 : vector<2x2xf32> to vector<1x2x2xf32>
    %cst_47 = arith.constant dense<0.000000e+00> : vector<1xf32>
    %111 = vector.multi_reduction <add>, %110, %cst_47 [1, 2] : vector<1x2x2xf32> to vector<1xf32>
    %112 = vector.shape_cast %111 : vector<1xf32> to vector<1x1x1xf32>
    %113 = vector.extract %112[0, 0, 0] : f32 from vector<1x1x1xf32>
    %cst_48 = arith.constant 2.500000e-01 : f32
    %114 = arith.mulf %113, %cst_48 : f32
    %cst_49 = arith.constant 3.200000e-01 : f32
    %115 = arith.mulf %cst_49, %105 : f32
    %116 = arith.addf %94, %115 : f32
    %cst_50 = arith.constant 3.200000e-01 : f32
    %117 = arith.mulf %cst_50, %114 : f32
    %118 = arith.addf %96, %117 : f32
    %119 = tpu.iota {dimensions = array<i32: 1>} : vector<1x8x128xi32>
    %c4_i32 = arith.constant 4 : i32
    %120 = vector.broadcast %c4_i32 : i32 to vector<1x8x128xi32>
    %121 = arith.cmpi slt, %119, %120 : vector<1x8x128xi32>
    %122 = vector.broadcast %116 : f32 to vector<1x8x128xf32>
    %123 = vector.broadcast %118 : f32 to vector<1x8x128xf32>
    %124 = arith.select %121, %122, %123 : vector<1x8x128xi1>, vector<1x8x128xf32>
    %c0_51 = arith.constant 0 : index
    %c0_52 = arith.constant 0 : index
    %c0_53 = arith.constant 0 : index
    %125 = vector.load %arg6[%c0_51, %c0_52, %c0_53] : memref<1x8x128xf32, #tpu.memory_space<vmem>>, vector<1x8x128xf32>
    tpu.vector_store %arg6[%c0_51, %c0_52, %c0_53], %124 {strides = array<i32>} : memref<1x8x128xf32, #tpu.memory_space<vmem>>, vector<1x8x128xf32>,
    return
  }
  func.func @transform_0(%arg0: i32) -> (i32, i32) {
    %c0_i32 = arith.constant 0 : i32
    %c0_i32_0 = arith.constant 0 : i32
    %c0_i32_1 = arith.constant 0 : i32
    return %c0_i32, %c0_i32_0 : i32, i32
  }
  func.func @transform_1(%arg0: i32) -> (i32, i32) {
    %c0_i32 = arith.constant 0 : i32
    %c0_i32_0 = arith.constant 0 : i32
    %c0_i32_1 = arith.constant 0 : i32
    return %c0_i32, %c0_i32_0 : i32, i32
  }
  func.func @transform_2(%arg0: i32) -> (i32, i32) {
    %c0_i32 = arith.constant 0 : i32
    %c0_i32_0 = arith.constant 0 : i32
    %c0_i32_1 = arith.constant 0 : i32
    return %c0_i32, %c0_i32_0 : i32, i32
  }
  func.func @transform_3(%arg0: i32) -> (i32, i32, i32, i32) {
    %c0_i32 = arith.constant 0 : i32
    %c0_i32_0 = arith.constant 0 : i32
    %c0_i32_1 = arith.constant 0 : i32
    %c0_i32_2 = arith.constant 0 : i32
    return %arg0, %c0_i32, %c0_i32_0, %c0_i32_1 : i32, i32, i32, i32
  }
  func.func @transform_4(%arg0: i32) -> (i32, i32, i32) {
    %c0_i32 = arith.constant 0 : i32
    %c0_i32_0 = arith.constant 0 : i32
    %c0_i32_1 = arith.constant 0 : i32
    return %arg0, %c0_i32, %c0_i32_0 : i32, i32, i32
  }
  func.func @transform_5(%arg0: i32) -> (i32, i32, i32) {
    %c0_i32 = arith.constant 0 : i32
    %c0_i32_0 = arith.constant 0 : i32
    %c0_i32_1 = arith.constant 0 : i32
    return %arg0, %c0_i32, %c0_i32_0 : i32, i32, i32
  }
}

</mosaic_0001>

<bundles_post_ra>
// kernel: multiscale_forward.1
= control target key start
LH: loop header
LB: loop body
LE: loop exit
PB: predicated region body
PF: predicated region fallthrough
CT: control target
= control target key end

     0   :  { %s1390_s18 = smov 0   ;;  %s1594_s0 = inlined_call_operand.vmem [shape: f32[128,32], index: 0, kind: input, shape index: {}]   ;;  %s1595_s1 = inlined_call_operand.vmem [shape: f32[32,30], index: 1, kind: input, shape index: {}]   ;;  %s1596_s2 = inlined_call_operand.vmem [shape: f32[60,64], index: 2, kind: input, shape index: {}]   ;;  %s1597_s3 = inlined_call_operand.vmem [shape: f32[2,2,32,128], index: 3, kind: input, shape index: {}]   ;;  %s1598_s4 = inlined_call_operand.vmem [shape: f32[2,124,32], index: 4, kind: input, shape index: {}]   ;;  %s1599_s5 = inlined_call_operand.vmem [shape: f32[2,8,128], index: 5, kind: output, shape index: {}]  }
   0x1   :  { %1600 = sst [smem:[#allocation2_spill]] %s1594_s0 }
   0x2   :  { %1601 = sst [smem:[#allocation3_spill]] %s1595_s1 }
   0x3   :  { %1602 = sst [smem:[#allocation4_spill]] %s1596_s2 }
   0x4   :  { %1603 = sst [smem:[#allocation5_spill]] %s1597_s3 }
   0x5 LB: > { %s1068_s19 = sadd.s32 4294967295, %s1354_s18   ;;  %p1072_p0 = scmp.ge.s32.totalorder %s1354_s18, 1  ;;  %s1354_s18 = sphi %s1390_s18, %s15_s18  }
   0x6   : > { %p197_p1 = scmp.lt.s32.totalorder %s1354_s18, 3 }
   0x8   : > { %p198_p2 = pnand %p1072_p0, %p197_p1 }
   0x9   : > { %s1604_s0 = sld [smem:[#allocation2_spill]] (!%p198_p2)  ;;  %p229_p3 = scmp.lt.s32.totalorder (!%p198_p2), %s1068_s19, 1  ;;  %vm404_vm0 = vcmask (!%p198_p2), 261120   ;;  %vm640_vm9 = vcmask (!%p198_p2), 523264   ;;  %vm778_vm10 = vcmask (!%p198_p2), 130048   ;;  %vm849_vm15 = vcmask (!%p198_p2), 64512  }
   0xa   : > { %201 = sbr.rel (%p198_p2) target bundleno = 1079 (0x437), region = 40  ;;  %s1605_s3 = sld [smem:[#allocation5_spill]] (!%p198_p2) }
   0xb   : > { %s1606_s1 = sld [smem:[#allocation3_spill]] (!%p198_p2)  ;;  %s1607_s2 = sld [smem:[#allocation4_spill]] (!%p198_p2) }
   0xc   : > { %s1356_s14 = smov (!%p198_p2), 112   ;;  %s1357_s15 = smov (!%p198_p2), 104  }
   0xd   : > { %s1358_s16 = smov (!%p198_p2), 100  }
   0xf   : > { %v251_v0 = vld [vmem:[%s1604_s0] sm:$0xff] (!%p198_p2)  ;;  %v252_v1 = vld [vmem:[%s1604_s0 + $0x8] sm:$0xff] (!%p198_p2)  ;;  %v253_v2 = vld [vmem:[%s1604_s0 + $0x10] sm:$0xff] (!%p198_p2) }
  0x10   : > { %v1242_v3 = vpack.c.bf16 (!%p198_p2), %v252_v1, %v251_v0  ;;  %v254_v4 = vld [vmem:[%s1604_s0 + $0x18] sm:$0xff] (!%p198_p2)  ;;  %v255_v6 = vld [vmem:[%s1604_s0 + $0x20] sm:$0xff] (!%p198_p2)  ;;  %v256_v7 = vld [vmem:[%s1604_s0 + $0x28] sm:$0xff] (!%p198_p2) }
  0x11   : > { %v1246_v5 = vpack.c.bf16 %v254_v4, %v253_v2  ;;  %s1609_s19 = smov (!%p229_p3, %s1068_s19), 1  ;;  %v1250_v8 = vpack.c.bf16 %v256_v7, %v255_v6  ;;  %v499_v9 = vld [vmem:[%s1606_s1] sm:$0xff]  ;;  %v500_v10 = vld [vmem:[%s1606_s1 + $0x8] sm:$0xff]  ;;  %v257_v11 = vld [vmem:[%s1604_s0 + $0x30] sm:$0xff] }
  0x12   : > { %1243 = vmatprep.subr.bf16.mxu0 %v1242_v3  ;;  %s1096_s7 = sshll.u32 %s1609_s19, 6  ;;  %v258_v12 = vld [vmem:[%s1604_s0 + $0x38] sm:$0xff]  ;;  %v1274_v14 = vpack.c.bf16 %v500_v10, %v499_v9  ;;  %v501_v15 = vld [vmem:[%s1606_s1 + $0x10] sm:$0xff]  ;;  %v259_v18 = vld [vmem:[%s1604_s0 + $0x40] sm:$0xff]  ;;  %s1097_s17 = sshll.u32 %s1609_s19, 7 }
  0x13   : > { %1245 = vmatpush3.bf16.msra.mxu0 %v1242_v3  ;;  %s1422_s10 = scalar_lea.vmem %s1605_s3, %s1096_s7  ;;  %v1254_v16 = vpack.c.bf16 %v258_v12, %v257_v11  ;;  %v502_v17 = vld [vmem:[%s1606_s1 + $0x18] sm:$0xff]  ;;  %v260_v19 = vld [vmem:[%s1604_s0 + $0x48] sm:$0xff]  ;;  %v261_v22 = vld [vmem:[%s1604_s0 + $0x50] sm:$0xff]  ;;  %s1478_s22 = scalar_lea.vmem %s1598_s4, %s1097_s17 }
  0x14   : > { %1247 = vmatprep.subr.bf16.mxu0 %v1246_v5  ;;  %v243_v13 = vld [vmem:[%s1422_s10] sm:$0xff]  ;;  %1275 = vmatprep.subr.bf16.mxu1 %v1274_v14  ;;  %v1278_v20 = vpack.c.bf16 %v502_v17, %v501_v15  ;;  %v1258_v21 = vpack.c.bf16 %v260_v19, %v259_v18  ;;  %v262_v23 = vld [vmem:[%s1604_s0 + $0x58] sm:$0xff]  ;;  %v264_v26 = vld [vmem:[%s1604_s0 + $0x68] sm:$0xff]  ;;  %s1077_s12 = sshll.u32 %s1609_s19, 3 }
  0x15   : > { %1182 = vmatprep.mubr.f32.mxu0 %v243_v13  ;;  %1277 = vmatpush3.bf16.msra.mxu1 %v1274_v14  ;;  %v1262_v24 = vpack.c.bf16 %v262_v23, %v261_v22  ;;  %v263_v25 = vld [vmem:[%s1604_s0 + $0x60] sm:$0xff]  ;;  %v265_v28 = vld [vmem:[%s1604_s0 + $0x70] sm:$0xff]  ;;  %v266_v29 = vld [vmem:[%s1604_s0 + $0x78] sm:$0xff] }
  0x16   : > { %1279 = vmatprep.subr.bf16.mxu1 %v1278_v20  ;;  %v1266_v27 = vpack.c.bf16 %v264_v26, %v263_v25  ;;  %v1270_v30 = vpack.c.bf16 %v266_v29, %v265_v28  ;;  %v244_v31 = vld [vmem:[%s1422_s10 + $0x8] sm:$0xff]  ;;  %v245_v32 = vld [vmem:[%s1422_s10 + $0x10] sm:$0xff]  ;;  %v246_v33 = vld [vmem:[%s1422_s10 + $0x18] sm:$0xff] }
  0x17   : > { %1249 = vmatpush3.bf16.msra.mxu0 %v1246_v5  ;;  %v247_v34 = vld [vmem:[%s1422_s10 + $0x20] sm:$0xff]  ;;  %v248_v35 = vld [vmem:[%s1422_s10 + $0x28] sm:$0xff]  ;;  %v249_v36 = vld [vmem:[%s1422_s10 + $0x30] sm:$0xff] }
  0x18   : > { %1251 = vmatprep.subr.bf16.mxu0 %v1250_v8  ;;  %v250_v37 = vld [vmem:[%s1422_s10 + $0x38] sm:$0xff]  ;;  %v373_v38 = vld [vmem:[%s1478_s22 + $0x8] sm:$0xff]  ;;  %v372_v39 = vld [vmem:[%s1478_s22] sm:$0xff] }
  0x19   : > { %1281 = vmatpush3.bf16.msra.mxu1 %v1278_v20  ;;  %v375_v44 = vld [vmem:[%s1478_s22 + $0x18] sm:$0xff]  ;;  %v374_v47 = vld [vmem:[%s1478_s22 + $0x10] sm:$0xff]  ;;  %v377_v58 = vld [vmem:[%s1478_s22 + $0x28] sm:$0xff] }
  0x1a   : > { %v376_v62 = vld [vmem:[%s1478_s22 + $0x20] sm:$0xff]  ;;  %v379_v9 = vld [vmem:[%s1478_s22 + $0x38] sm:$0xff]  ;;  %v378_v13 = vld [vmem:[%s1478_s22 + $0x30] sm:$0xff] }
  0x1b   : > { %1253 = vmatpush3.bf16.msra.mxu0 %v1250_v8 }
  0x1c   : > { %1255 = vmatprep.subr.bf16.mxu0 %v1254_v16 }
  0x1f   : > { %1257 = vmatpush3.bf16.msra.mxu0 %v1254_v16 }
  0x20   : > { %1259 = vmatprep.subr.bf16.mxu0 %v1258_v21 }
  0x23   : > { %1261 = vmatpush3.bf16.msra.mxu0 %v1258_v21 }
  0x24   : > { %1263 = vmatprep.subr.bf16.mxu0 %v1262_v24 }
  0x27   : > { %1265 = vmatpush3.bf16.msra.mxu0 %v1262_v24 }
  0x28   : > { %1267 = vmatprep.subr.bf16.mxu0 %v1266_v27 }
  0x2b   : > { %1269 = vmatpush3.bf16.msra.mxu0 %v1266_v27 }
  0x2c   : > { %1271 = vmatprep.subr.bf16.mxu0 %v1270_v30 }
  0x2f   : > { %1273 = vmatpush3.bf16.msra.mxu0 %v1270_v30 }
  0x32   : > { %1183 = vmatmul.mubr.f32.vlgmr.msra.gmra.mrb[0].mxu0 %v244_v31 }
  0x33   : > { %1185 = vmatprep.mubr.f32.mxu0 %v245_v32 }
  0x36   : > { %1186 = vmatmul.mubr.f32.gmra.mrb[2].mxu0 %v246_v33 }
  0x37   : > { %1188 = vmatprep.mubr.f32.mxu0 %v247_v34 }
  0x3a   : > { %1189 = vmatmul.mubr.f32.gmra.mrb[4].mxu0 %v248_v35 }
  0x3b   : > { %1191 = vmatprep.mubr.f32.mxu0 %v249_v36 }
  0x3e   : > { %1192 = vmatmul.mubr.f32.gmra.mrb[6].mxu0 %v250_v37 }
 0x105   : > { %v1184_v40 = vpop.f32.mrb[0].mxu0 }
 0x106   : > { %v389_v41 = vsub.f32 %v373_v38, %v1184_v40  ;;  %v333_v42 = vpop.f32.mrb[1].mxu0 }
 0x107   : > { %v388_v43 = vsub.f32 %v372_v39, %v333_v42  ;;  %1202 = vmatprep.mubr.msk.f32.mxu1 %vm404_vm0, %v333_v42 }
 0x108   : > { %v397_v45 = vand.u32 2147483647, %v389_v41  ;;  %v431_v46 = vmul.f32 %v389_v41, %v389_v41  ;;  %1203 = vmatmul.mubr.msk.f32.vlgmr.msra.gmra.mrb[0].mxu1 %vm404_vm0, %v1184_v40 }
 0x109   : > { %v396_v48 = vand.u32 2147483647, %v388_v43  ;;  %v430_v49 = vmul.f32 %v388_v43, %v388_v43  ;;  %v1187_v50 = vpop.f32.mrb[2].mxu0 }
 0x10a   : > { %v406_v51 = vsel %vm404_vm0, %v397_v45, 0.0  ;;  %v441_v52 = vsel %vm404_vm0, %v431_v46, 0.0  ;;  %v391_v53 = vsub.f32 %v375_v44, %v1187_v50  ;;  %v343_v54 = vpop.f32.mrb[3].mxu0 }
 0x10b   : > { %v405_v55 = vsel %vm404_vm0, %v396_v48, 0.0  ;;  %v438_v56 = vsel %vm404_vm0, %v430_v49, 0.0  ;;  %v390_v57 = vsub.f32 %v374_v47, %v343_v54  ;;  %1205 = vmatprep.mubr.msk.f32.mxu1 %vm404_vm0, %v343_v54 }
 0x10c   : > { %v407_v59 = vadd.f32 %v406_v51, %v405_v55  ;;  %v399_v60 = vand.u32 2147483647, %v391_v53  ;;  %v433_v61 = vmul.f32 %v391_v53, %v391_v53  ;;  %1206 = vmatmul.mubr.msk.f32.gmra.mrb[2].mxu1 %vm404_vm0, %v1187_v50 }
 0x10d   : > { %v398_v63 = vand.u32 2147483647, %v390_v57  ;;  %v432_v0 = vmul.f32 %v390_v57, %v390_v57  ;;  %v1190_v1 = vpop.f32.mrb[4].mxu0 }
 0x10e   : > { %v410_v2 = vsel %vm404_vm0, %v399_v60, 0.0  ;;  %v447_v3 = vsel %vm404_vm0, %v433_v61, 0.0  ;;  %v393_v4 = vsub.f32 %v377_v58, %v1190_v1  ;;  %v353_v5 = vpop.f32.mrb[5].mxu0 }
 0x10f   : > { %v408_v6 = vsel %vm404_vm0, %v398_v63, 0.0  ;;  %v444_v7 = vsel %vm404_vm0, %v432_v0, 0.0  ;;  %v392_v8 = vsub.f32 %v376_v62, %v353_v5  ;;  %1208 = vmatprep.mubr.msk.f32.mxu1 %vm404_vm0, %v353_v5 }
 0x110   : > { %v409_v10 = vadd.f32 %v408_v6, %v407_v59  ;;  %v401_v11 = vand.u32 2147483647, %v393_v4  ;;  %v435_v12 = vmul.f32 %v393_v4, %v393_v4  ;;  %1209 = vmatmul.mubr.msk.f32.gmra.mrb[4].mxu1 %vm404_vm0, %v1190_v1  ;;  %v632_v4 = vld [vmem:[%s1607_s2] sm:$0xff] }
 0x111   : > { %v400_v14 = vand.u32 2147483647, %v392_v8  ;;  %v434_v15 = vmul.f32 %v392_v8, %v392_v8  ;;  %v1193_v16 = vpop.f32.mrb[6].mxu0 }
 0x112   : > { %v414_v17 = vsel %vm404_vm0, %v401_v11, 0.0  ;;  %v442_v18 = vsel %vm404_vm0, %v435_v12, 0.0  ;;  %v411_v19 = vadd.f32 %v410_v2, %v409_v10  ;;  %v395_v20 = vsub.f32 %v379_v9, %v1193_v16  ;;  %v363_v21 = vpop.f32.mrb[7].mxu0 }
 0x113   : > { %v443_v22 = vadd.f32 %v442_v18, %v441_v52  ;;  %v412_v23 = vsel %vm404_vm0, %v400_v14, 0.0  ;;  %v439_v24 = vsel %vm404_vm0, %v434_v15, 0.0  ;;  %v394_v25 = vsub.f32 %v378_v13, %v363_v21  ;;  %1211 = vmatprep.mubr.msk.f32.mxu1 %vm404_vm0, %v363_v21  ;;  %v634_v18 = vld [vmem:[%s1607_s2 + $0x10] sm:$0xff]  ;;  %v637_v21 = vld [vmem:[%s1607_s2 + $0x28] sm:$0xff] }
 0x114   : > { %v413_v26 = vadd.f32 %v412_v23, %v411_v19  ;;  %v440_v27 = vadd.f32 %v439_v24, %v438_v56  ;;  %v403_v28 = vand.u32 2147483647, %v395_v20  ;;  %v437_v29 = vmul.f32 %v395_v20, %v395_v20  ;;  %1212 = vmatmul.mubr.msk.f32.gmra.mrb[6].mxu1 %vm404_vm0, %v1193_v16  ;;  %v635_v19 = vld [vmem:[%s1607_s2 + $0x18] sm:$0xff]  ;;  %v636_v20 = vld [vmem:[%s1607_s2 + $0x20] sm:$0xff]  ;;  %v381_v24 = vld [vmem:[%s1478_s22 + $0x48] sm:$0xff] }
 0x115   : > { %1330 = vrsqrt.f32 %v443_v22  ;;  %v402_v30 = vand.u32 2147483647, %v394_v25  ;;  %v436_v31 = vmul.f32 %v394_v25, %v394_v25  ;;  %vm459_vm1 = vcmp.eq.f32.partialorder %v443_v22, inf  ;;  %1230 = vmatprep.mubr.msk.f32.mxu1 %vm640_vm9, %v632_v4  ;;  %v639_v23 = vld [vmem:[%s1607_s2 + $0x38] sm:$0xf]  ;;  %v380_v25 = vld [vmem:[%s1478_s22 + $0x40] sm:$0xff] }
 0x116   : > { %1332 = vrsqrt.f32 %v440_v27  ;;  %v448_v32 = vsel %vm404_vm0, %v437_v29, 0.0  ;;  %v415_v33 = vadd.f32 %v414_v17, %v413_v26  ;;  %v418_v34 = vsel %vm404_vm0, %v403_v28, 0.0  ;;  %v633_v17 = vld [vmem:[%s1607_s2 + $0x8] sm:$0xff] }
 0x117   : > { %v449_v35 = vadd.f32 %v448_v32, %v447_v3  ;;  %v445_v36 = vsel %vm404_vm0, %v436_v31, 0.0  ;;  %v416_v37 = vsel %vm404_vm0, %v402_v30, 0.0  ;;  %v462_v45 = vand.u32 2147483648, %v443_v22  ;;  %v383_v30 = vld [vmem:[%s1478_s22 + $0x58] sm:$0xff]  ;;  %v382_v32 = vld [vmem:[%s1478_s22 + $0x50] sm:$0xff] }
 0x118   : > { %v446_v38 = vadd.f32 %v445_v36, %v444_v7  ;;  %v417_v39 = vadd.f32 %v416_v37, %v415_v33  ;;  %vm452_vm2 = vcmp.eq.f32.partialorder %v440_v27, inf  ;;  %v455_v46 = vand.u32 2147483648, %v440_v27 }
 0x119   : > { %1334 = vrsqrt.f32 %v449_v35  ;;  %vm461_vm3 = vcmp.eq.f32.partialorder %v443_v22, 0.0  ;;  %vm454_vm4 = vcmp.eq.f32.partialorder %v440_v27, 0.0  ;;  %vm473_vm5 = vcmp.eq.f32.partialorder %v449_v35, inf }
 0x11a   : > { %v1512_v40 = vadd.f32 %v418_v34, %v417_v39  ;;  %1336 = vrsqrt.f32 %v446_v38  ;;  %vm466_vm6 = vcmp.eq.f32.partialorder %v446_v38, inf  ;;  %v476_v56 = vand.u32 2147483648, %v449_v35 }
 0x11b   : > { %v469_v58 = vand.u32 2147483648, %v446_v38  ;;  %vm475_vm7 = vcmp.eq.f32.partialorder %v449_v35, 0.0  ;;  %vm468_vm8 = vcmp.eq.f32.partialorder %v446_v38, 0.0 }
 0x11f   : > { %v1331_v41 = vpop.eup %1330 }
 0x120   : > { %v1333_v42 = vpop.eup %1332  ;;  %v458_v43 = vmul.f32 %v1331_v41, %v443_v22 }
 0x121   : > { %v451_v44 = vmul.f32 %v1333_v42, %v440_v27 }
 0x122   : > { %v460_v47 = vsel %vm459_vm1, %v443_v22, %v458_v43  ;;  %v638_v22 = vld [vmem:[%s1607_s2 + $0x30] sm:$0xff]  ;;  %vm896_vm1 = vcmask 31744  }
 0x123   : > { %v1335_v48 = vpop.eup %1334  ;;  %v453_v49 = vsel %vm452_vm2, %v440_v27, %v451_v44  ;;  %v463_v50 = vsel %vm461_vm3, %v462_v45, %v460_v47  ;;  %vm970_vm2 = vcmask 9216   ;;  %vm945_vm3 = vcmask 11264  }
 0x124   : > { %v1337_v51 = vpop.eup %1336  ;;  %v456_v52 = vsel %vm454_vm4, %v455_v46, %v453_v49  ;;  %v472_v53 = vmul.f32 %v1335_v48, %v449_v35  ;;  %v479_v54 = vsel %vm404_vm0, %v463_v50, 0.0 }
 0x125   : > { %v465_v55 = vmul.f32 %v1337_v51, %v446_v38  ;;  %v478_v57 = vsel %vm404_vm0, %v456_v52, 0.0 }
 0x126   : > { %v474_v59 = vsel %vm473_vm5, %v449_v35, %v472_v53  ;;  %v480_v60 = vadd.f32 %v479_v54, %v478_v57 }
 0x127   : > { %v467_v61 = vsel %vm466_vm6, %v446_v38, %v465_v55  ;;  %v477_v62 = vsel %vm475_vm7, %v476_v56, %v474_v59 }
 0x128   : > { %v470_v63 = vsel %vm468_vm8, %v469_v58, %v467_v61  ;;  %v483_v0 = vsel %vm404_vm0, %v477_v62, 0.0 }
 0x129   : > { %v481_v1 = vsel %vm404_vm0, %v470_v63, 0.0  ;;  %vm913_vm0 = vcmask 27648  }
 0x12a   : > { %v482_v2 = vadd.f32 %v481_v1, %v480_v60 }
 0x12c   : > { %v1518_v3 = vadd.f32 %v483_v0, %v482_v2 }
 0x1db   : > { %v1204_v5 = vpop.f32.mrb[0].mxu1 }
 0x1dc   : > { %v593_v6 = vpop.f32.mrb[1].mxu1 }
 0x1dd   : > { %v1282_v7 = vpack.c.bf16 %v1204_v5, %v593_v6 }
 0x1df   : > { %v1207_v8 = vpop.f32.mrb[2].mxu1  ;;  %1283 = vmatprep.subr.bf16.mxu1 %v1282_v7 }
 0x1e0   : > { %v603_v9 = vpop.f32.mrb[3].mxu1  ;;  %1285 = vmatpush3.bf16.msra.mxu1 %v1282_v7 }
 0x1e1   : > { %v1286_v10 = vpack.c.bf16 %v1207_v8, %v603_v9 }
 0x1e3   : > { %v1210_v11 = vpop.f32.mrb[4].mxu1  ;;  %1287 = vmatprep.subr.bf16.mxu1 %v1286_v10 }
 0x1e4   : > { %v613_v12 = vpop.f32.mrb[5].mxu1  ;;  %1289 = vmatpush3.bf16.msra.mxu1 %v1286_v10 }
 0x1e5   : > { %v1290_v13 = vpack.c.bf16 %v1210_v11, %v613_v12  ;;  %v384_v12 = vld [vmem:[%s1478_s22 + $0x60] sm:$0xff] }
 0x1e7   : > { %v1213_v14 = vpop.f32.mrb[6].mxu1  ;;  %1291 = vmatprep.subr.bf16.mxu1 %v1290_v13 }
 0x1e8   : > { %v623_v15 = vpop.f32.mrb[7].mxu1  ;;  %1293 = vmatpush3.bf16.msra.mxu1 %v1290_v13  ;;  %v1359_v13 = vmov 1983009808  }
 0x1e9   : > { %v1294_v16 = vpack.c.bf16 %v1213_v14, %v623_v15  ;;  %v959_v14 = vunpack.c.l.s4 %v1359_v13  ;;  %v961_v15 = vlaneseq }
 0x1eb   : > { %1295 = vmatprep.subr.bf16.mxu1 %v1294_v16 }
 0x1ec   : > { %1297 = vmatpush3.bf16.msra.mxu1 %v1294_v16 }
 0x1ef   : > { %1231 = vmatmul.mubr.msk.f32.vlgmr.msra.gmra.mrb[8].mxu1 %vm640_vm9, %v633_v17 }
 0x1f0   : > { %1233 = vmatprep.mubr.msk.f32.mxu1 %vm640_vm9, %v634_v18  ;;  %v385_v18 = vld [vmem:[%s1478_s22 + $0x68] sm:$0xff] }
 0x1f3   : > { %1234 = vmatmul.mubr.msk.f32.gmra.mrb[10].mxu1 %vm640_vm9, %v635_v19  ;;  %v386_v19 = vld [vmem:[%s1478_s22 + $0x70] sm:$0xff] }
 0x1f4   : > { %1236 = vmatprep.mubr.msk.f32.mxu1 %vm640_vm9, %v636_v20  ;;  %v960_v20 = vunpack.c.0.s8 %v959_v14 }
 0x1f7   : > { %1237 = vmatmul.mubr.msk.f32.gmra.mrb[12].mxu1 %vm640_vm9, %v637_v21  ;;  %v1571_v21 = vshrl.u32 %v961_v15, 7 }
 0x1f8   : > { %1239 = vmatprep.mubr.msk.f32.mxu1 %vm640_vm9, %v638_v22 }
 0x1fb   : > { %1240 = vmatmul.mubr.msk.f32.gmra.mrb[14].mxu1 %vm640_vm9, %v639_v23 }
 0x2c2   : > { %v1232_v26 = vpop.f32.mrb[8].mxu1 }
 0x2c3   : > { %v771_v27 = vsub.f32 %v381_v24, %v1232_v26  ;;  %v731_v28 = vpop.f32.mrb[9].mxu1 }
 0x2c4   : > { %v770_v29 = vsub.f32 %v380_v25, %v731_v28 }
 0x2c5   : > { %v775_v31 = vand.u32 2147483647, %v771_v27  ;;  %v797_v36 = vmul.f32 %v771_v27, %v771_v27 }
 0x2c6   : > { %v774_v33 = vand.u32 2147483647, %v770_v29  ;;  %v1235_v34 = vpop.f32.mrb[10].mxu1  ;;  %v796_v41 = vmul.f32 %v770_v29, %v770_v29 }
 0x2c7   : > { %v780_v35 = vsel %vm778_vm10, %v775_v31, 0.0  ;;  %v773_v37 = vsub.f32 %v383_v30, %v1235_v34  ;;  %v741_v38 = vpop.f32.mrb[11].mxu1  ;;  %v803_v49 = vsel %vm778_vm10, %v797_v36, 0.0  ;;  %v963_v30 = vsub.s32 %v960_v20, %v1571_v21 }
 0x2c8   : > { %v779_v39 = vsel %vm778_vm10, %v774_v33, 0.0  ;;  %v772_v42 = vsub.f32 %v382_v32, %v741_v38  ;;  %v800_v52 = vsel %vm778_vm10, %v796_v41, 0.0 }
 0x2c9   : > { %v799_v43 = vmul.f32 %v773_v37, %v773_v37  ;;  %v781_v44 = vadd.f32 %v780_v35, %v779_v39  ;;  %v777_v45 = vand.u32 2147483647, %v773_v37 }
 0x2ca   : > { %v776_v46 = vand.u32 2147483647, %v772_v42  ;;  %v798_v47 = vmul.f32 %v772_v42, %v772_v42  ;;  %v1238_v48 = vpop.f32.mrb[12].mxu1 }
 0x2cb   : > { %v804_v50 = vsel %vm778_vm10, %v799_v43, 0.0  ;;  %v751_v51 = vpop.f32.mrb[13].mxu1  ;;  %v784_v59 = vsel %vm778_vm10, %v777_v45, 0.0 }
 0x2cc   : > { %v805_v53 = vadd.f32 %v804_v50, %v803_v49  ;;  %v801_v54 = vsel %vm778_vm10, %v798_v47, 0.0  ;;  %839 = vrot.lane.b32.xlu0 %v751_v51, %s1356_s14  ;;  %v782_v55 = vsel %vm778_vm10, %v776_v46, 0.0 }
 0x2cd   : > { %v802_v56 = vadd.f32 %v801_v54, %v800_v52  ;;  %v783_v57 = vadd.f32 %v782_v55, %v781_v44 }
 0x2ce   : > { %v1241_v58 = vpop.f32.mrb[14].mxu1  ;;  %1338 = vrsqrt.f32 %v805_v53  ;;  %vm815_vm11 = vcmp.eq.f32.partialorder %v805_v53, inf  ;;  %v818_v2 = vand.u32 2147483648, %v805_v53  ;;  %vm817_vm13 = vcmp.eq.f32.partialorder %v805_v53, 0.0 }
 0x2cf   : > { %v761_v60 = vpop.f32.mrb[15].mxu1  ;;  %v785_v61 = vadd.f32 %v784_v59, %v783_v57  ;;  %1340 = vrsqrt.f32 %v802_v56  ;;  %vm808_vm12 = vcmp.eq.f32.partialorder %v802_v56, inf  ;;  %v811_v4 = vand.u32 2147483648, %v802_v56 }
 0x2d0   : > { %841 = vrot.lane.b32.xlu0 %v1238_v48, %s1356_s14  ;;  %891 = vrot.lane.b32.xlu1 %v761_v60, %s1357_s15  ;;  %vm810_vm14 = vcmp.eq.f32.partialorder %v802_v56, 0.0 }
 0x2d4   : > { %940 = vrot.lane.b32.xlu1 %v1241_v58, %s1358_s16 }
 0x2d8   : > { %v1339_v62 = vpop.eup %1338 }
 0x2d9   : > { %v1341_v63 = vpop.eup %1340  ;;  %v814_v0 = vmul.f32 %v1339_v62, %v805_v53 }
 0x2da   : > { %v807_v1 = vmul.f32 %v1341_v63, %v802_v56 }
 0x2db   : > { %v816_v5 = vsel %vm815_vm11, %v805_v53, %v814_v0 }
 0x2dc   : > { %v809_v6 = vsel %vm808_vm12, %v802_v56, %v807_v1  ;;  %v819_v7 = vsel %vm817_vm13, %v818_v2, %v816_v5 }
 0x2dd   : > { %v812_v8 = vsel %vm810_vm14, %v811_v4, %v809_v6  ;;  %v821_v9 = vsel %vm778_vm10, %v819_v7, 0.0 }
 0x2de   : > { %v820_v10 = vsel %vm778_vm10, %v812_v8, 0.0  ;;  %vm998_vm10 = vcmp.lt.s32.totalorder %v1571_v21, 4 }
 0x2df   : > { %v822_v11 = vadd.f32 %v821_v9, %v820_v10 }
 0x2ef   : > { %420 = vadd.xlane.f32.xlu0 %v1512_v40 }
 0x2f3   : > { %786 = vadd.xlane.f32.xlu0 %v785_v61 }
 0x2f7   : > { %823 = vadd.xlane.f32.xlu0 %v822_v11 }
 0x2f8   : > { %485 = vadd.xlane.f32.xlu1 %v1518_v3  ;;  %v387_v3 = vld [vmem:[%s1478_s22 + $0x78] sm:$0xf] }
 0x33e   : > { %v840_v16 = vpop.permute.xlu0 %839 }
 0x33f   : > { %v845_v17 = vsub.f32 %v384_v12, %v840_v16 }
 0x341   : > { %v847_v22 = vand.u32 2147483647, %v845_v17  ;;  %v863_v23 = vmul.f32 %v845_v17, %v845_v17 }
 0x342   : > { %v842_v24 = vpop.permute.xlu0 %841  ;;  %v892_v40 = vpop.permute.xlu1 %891 }
 0x343   : > { %v846_v25 = vsub.f32 %v385_v18, %v842_v24  ;;  %v894_v26 = vsub.f32 %v386_v19, %v892_v40  ;;  %v865_v31 = vsel %vm849_vm15, %v863_v23, 0.0  ;;  %v850_v34 = vsel %vm849_vm15, %v847_v22, 0.0 }
 0x345   : > { %v848_v27 = vand.u32 2147483647, %v846_v25  ;;  %v864_v28 = vmul.f32 %v846_v25, %v846_v25  ;;  %v909_v29 = vcombine.high %v894_v26, %v894_v26  ;;  %v911_v32 = vmul.f32 %v894_v26, %v894_v26 }
 0x346   : > { %v941_v33 = vpop.permute.xlu1 %940  ;;  %v895_v43 = vand.u32 2147483647, %v894_v26 }
 0x347   : > { %v866_v35 = vsel %vm849_vm15, %v864_v28, 0.0  ;;  %v912_v36 = vmul.f32 %v909_v29, %v909_v29  ;;  %v943_v37 = vsub.f32 %v387_v3, %v941_v33  ;;  %v851_v38 = vsel %vm849_vm15, %v848_v27, 0.0 }
 0x348   : > { %v867_v39 = vadd.f32 %v866_v35, %v865_v31  ;;  %v852_v41 = vadd.f32 %v851_v38, %v850_v34  ;;  %v914_v45 = vsel %vm913_vm0, %v911_v32, 0.0  ;;  %v897_v50 = vsel %vm896_vm1, %v895_v43, 0.0 }
 0x349   : > { %v964_v42 = vrot.slane %v943_v37, %v963_v30  ;;  %v915_v44 = vsel %vm913_vm0, %v912_v36, 0.0  ;;  %v944_v51 = vand.u32 2147483647, %v943_v37 }
 0x34a   : > { %853 = vadd.xlane.f32.xlu1 %v852_v41  ;;  %1342 = vrsqrt.f32 %v867_v39  ;;  %v916_v48 = vadd.f32 %v915_v44, %v914_v45  ;;  %vm870_vm4 = vcmp.eq.f32.partialorder %v867_v39, inf  ;;  %v873_v58 = vand.u32 2147483648, %v867_v39 }
 0x34b   : > { %v965_v46 = vcombine.high %v964_v42, %v964_v42  ;;  %v968_v47 = vmul.f32 %v964_v42, %v964_v42  ;;  %v946_v55 = vsel %vm945_vm3, %v944_v51, 0.0  ;;  %vm872_vm5 = vcmp.eq.f32.partialorder %v867_v39, 0.0 }
 0x34c   : > { %1344 = vrsqrt.f32 %v916_v48  ;;  %vm919_vm6 = vcmp.eq.f32.partialorder %v916_v48, inf  ;;  %v922_v0 = vand.u32 2147483648, %v916_v48  ;;  %vm921_vm7 = vcmp.eq.f32.partialorder %v916_v48, 0.0 }
 0x34d   : > { %v969_v49 = vmul.f32 %v965_v46, %v965_v46  ;;  %v971_v52 = vsel %vm970_vm2, %v968_v47, 0.0 }
 0x34e   : > { %898 = vadd.xlane.f32.xlu1 %v897_v50 }
 0x34f   : > { %v972_v53 = vsel %vm970_vm2, %v969_v49, 0.0 }
 0x350   : > { %v973_v54 = vadd.f32 %v972_v53, %v971_v52 }
 0x352   : > { %947 = vadd.xlane.f32.xlu1 %v946_v55  ;;  %1346 = vrsqrt.f32 %v973_v54  ;;  %vm976_vm8 = vcmp.eq.f32.partialorder %v973_v54, inf  ;;  %v979_v7 = vand.u32 2147483648, %v973_v54  ;;  %vm978_vm9 = vcmp.eq.f32.partialorder %v973_v54, 0.0 }
 0x354   : > { %v1343_v56 = vpop.eup %1342 }
 0x355   : > { %v869_v57 = vmul.f32 %v1343_v56, %v867_v39 }
 0x356   : > { %v1345_v59 = vpop.eup %1344 }
 0x357   : > { %v871_v60 = vsel %vm870_vm4, %v867_v39, %v869_v57  ;;  %v918_v62 = vmul.f32 %v1345_v59, %v916_v48 }
 0x358   : > { %v874_v61 = vsel %vm872_vm5, %v873_v58, %v871_v60 }
 0x359   : > { %v875_v63 = vsel %vm849_vm15, %v874_v61, 0.0  ;;  %v920_v1 = vsel %vm919_vm6, %v916_v48, %v918_v62 }
 0x35a   : > { %876 = vadd.xlane.f32.xlu0 %v875_v63  ;;  %v923_v2 = vsel %vm921_vm7, %v922_v0, %v920_v1 }
 0x35b   : > { %v924_v5 = vsel %vm913_vm0, %v923_v2, 0.0 }
 0x35c   : > { %v1347_v4 = vpop.eup %1346 }
 0x35d   : > { %v975_v6 = vmul.f32 %v1347_v4, %v973_v54 }
 0x35e   : > { %925 = vadd.xlane.f32.xlu0 %v924_v5 }
 0x35f   : > { %v977_v8 = vsel %vm976_vm8, %v973_v54, %v975_v6 }
 0x360   : > { %v980_v9 = vsel %vm978_vm9, %v979_v7, %v977_v8 }
 0x361   : > { %v981_v10 = vsel %vm970_vm2, %v980_v9, 0.0 }
 0x362   : > { %982 = vadd.xlane.f32.xlu0 %v981_v10 }
 0x37c   : > { %v421_v11 = vpop.xlane.xlu0 %420 }
 0x37d   : > { %v422_v12 = vrot.slane %v421_v11, 4 }
 0x37f   : > { %v423_v13 = vadd.f32 %v422_v12, %v421_v11 }
 0x380   : > { %v787_v14 = vpop.xlane.xlu0 %786 }
 0x381   : > { %v424_v15 = vrot.slane %v423_v13, 2  ;;  %v788_v16 = vrot.slane %v787_v14, 4 }
 0x383   : > { %v789_v17 = vadd.f32 %v788_v16, %v787_v14  ;;  %v425_v18 = vadd.f32 %v424_v15, %v423_v13 }
 0x384   : > { %v824_v19 = vpop.xlane.xlu0 %823 }
 0x385   : > { %v790_v20 = vrot.slane %v789_v17, 2  ;;  %v825_v22 = vrot.slane %v824_v19, 4  ;;  %v486_v23 = vpop.xlane.xlu1 %485  ;;  %v426_v24 = vrot.slane %v425_v18, 1 }
 0x386   : > { %v487_v40 = vrot.slane %v486_v23, 4 }
 0x387   : > { %v826_v25 = vadd.f32 %v825_v22, %v824_v19  ;;  %v427_v26 = vadd.f32 %v426_v24, %v425_v18  ;;  %v791_v28 = vadd.f32 %v790_v20, %v789_v17 }
 0x388   : > { %v488_v3 = vadd.f32 %v487_v40, %v486_v23 }
 0x389   : > { %v827_v27 = vrot.slane %v826_v25, 2  ;;  %1298 = vpush %v427_v26  ;;  %v792_v32 = vrot.slane %v791_v28, 1 }
 0x38a   : > { %v489_v29 = vrot.slane %v488_v3, 2 }
 0x38b   : > { %v828_v30 = vadd.f32 %v827_v27, %v826_v25  ;;  %v793_v37 = vadd.f32 %v792_v32, %v791_v28 }
 0x38c   : > { %v490_v31 = vadd.f32 %v489_v29, %v488_v3 }
 0x38d   : > { %v829_v33 = vrot.slane %v828_v30, 1 }
 0x38e   : > { %v491_v34 = vrot.slane %v490_v31, 1 }
 0x38f   : > { %v830_v36 = vadd.f32 %v829_v33, %v828_v30 }
 0x390   : > { %v492_v35 = vadd.f32 %v491_v34, %v490_v31 }
 0x392   : > { %1300 = vpush %v492_v35 }
 0x393   : > { %1302 = vpush %v793_v37 }
 0x394   : > { %1304 = vpush %v830_v36 }
 0x3ba   : > { %s1299_s17 = spop %1298 }
 0x3bb   : > { %s429_s21 = smul.f32 0.00048828125, %s1299_s17 }
 0x3bd   : > { %s495_s25 = smul.f32 0.005, %s429_s21 }
 0x3c3   : > { %s1301_s20 = spop %1300 }
 0x3c4   : > { %s1303_s22 = spop %1302  ;;  %s494_s10 = smul.f32 0.0009765625, %s1301_s20 }
 0x3c5   : > { %s1305_s23 = spop %1304  ;;  %s795_s24 = smul.f32 0.001953125, %s1303_s22 }
 0x3c6   : > { %s832_s26 = smul.f32 0.00390625, %s1305_s23 }
 0x3c7   : > { %s497_s28 = smul.f32 0.005, %s494_s10 }
 0x3c8   : > { %s833_s29 = smul.f32 0.01, %s795_s24 }
 0x3c9   : > { %s835_s6 = smul.f32 0.01, %s832_s26 }
 0x3ca   : > { %s834_s13 = sadd.f32 %s833_s29, %s495_s25 }
 0x3cb   : > { %s836_s17 = sadd.f32 %s835_s6, %s497_s28  ;;  %s242_s28 = scalar_lea.vmem %s1599_s5, %s1077_s12 }
 0x3d7   : > { %v854_v38 = vpop.xlane.xlu1 %853 }
 0x3d8   : > { %v855_v39 = vrot.slane %v854_v38, 4 }
 0x3da   : > { %v856_v41 = vadd.f32 %v855_v39, %v854_v38 }
 0x3db   : > { %v899_v42 = vpop.xlane.xlu1 %898 }
 0x3dc   : > { %v857_v43 = vrot.slane %v856_v41, 2  ;;  %v900_v45 = vrot.slane %v899_v42, 4 }
 0x3de   : > { %v858_v44 = vadd.f32 %v857_v43, %v856_v41  ;;  %v901_v49 = vadd.f32 %v900_v45, %v899_v42 }
 0x3df   : > { %v948_v46 = vpop.xlane.xlu1 %947 }
 0x3e0   : > { %v859_v47 = vrot.slane %v858_v44, 1  ;;  %v949_v50 = vrot.slane %v948_v46, 4  ;;  %v902_v51 = vrot.slane %v901_v49, 2 }
 0x3e2   : > { %v860_v48 = vadd.f32 %v859_v47, %v858_v44  ;;  %v950_v52 = vadd.f32 %v949_v50, %v948_v46  ;;  %v903_v58 = vadd.f32 %v902_v51, %v901_v49 }
 0x3e4   : > { %1306 = vpush %v860_v48  ;;  %v951_v56 = vrot.slane %v950_v52, 2  ;;  %v904_v1 = vrot.slane %v903_v58, 1 }
 0x3e6   : > { %v952_v63 = vadd.f32 %v951_v56, %v950_v52  ;;  %v905_v9 = vadd.f32 %v904_v1, %v903_v58 }
 0x3e7   : > { %v877_v53 = vpop.xlane.xlu0 %876 }
 0x3e8   : > { %v878_v54 = vrot.slane %v877_v53, 4  ;;  %v953_v10 = vrot.slane %v952_v63, 1 }
 0x3ea   : > { %v879_v55 = vadd.f32 %v878_v54, %v877_v53  ;;  %v954_v15 = vadd.f32 %v953_v10, %v952_v63 }
 0x3eb   : > { %v926_v57 = vpop.xlane.xlu0 %925 }
 0x3ec   : > { %v880_v59 = vrot.slane %v879_v55, 2  ;;  %v927_v60 = vrot.slane %v926_v57, 4 }
 0x3ee   : > { %v928_v61 = vadd.f32 %v927_v60, %v926_v57  ;;  %v881_v62 = vadd.f32 %v880_v59, %v879_v55 }
 0x3ef   : > { %v983_v0 = vpop.xlane.xlu0 %982 }
 0x3f0   : > { %v929_v2 = vrot.slane %v928_v61, 2  ;;  %v984_v4 = vrot.slane %v983_v0, 4  ;;  %v882_v5 = vrot.slane %v881_v62, 1 }
 0x3f2   : > { %v985_v6 = vadd.f32 %v984_v4, %v983_v0  ;;  %v883_v7 = vadd.f32 %v882_v5, %v881_v62  ;;  %v930_v8 = vadd.f32 %v929_v2, %v928_v61 }
 0x3f4   : > { %v986_v11 = vrot.slane %v985_v6, 2  ;;  %1308 = vpush %v883_v7  ;;  %v931_v12 = vrot.slane %v930_v8, 1 }
 0x3f5   : > { %1310 = vpush %v905_v9 }
 0x3f6   : > { %v987_v13 = vadd.f32 %v986_v11, %v985_v6  ;;  %v932_v14 = vadd.f32 %v931_v12, %v930_v8 }
 0x3f8   : > { %1312 = vpush %v932_v14  ;;  %v988_v16 = vrot.slane %v987_v13, 1 }
 0x3f9   : > { %1314 = vpush %v954_v15 }
 0x3fa   : > { %v989_v17 = vadd.f32 %v988_v16, %v987_v13 }
 0x3fc   : > { %1316 = vpush %v989_v17 }
 0x415   : > { %s1307_s27 = spop %1306 }
 0x416   : > { %s862_s30 = smul.f32 0.0078125, %s1307_s27 }
 0x418   : > { %s886_s14 = smul.f32 0.02, %s862_s30 }
 0x41a   : > { %s887_s21 = sadd.f32 %s886_s14, %s834_s13 }
 0x425   : > { %s1309_s7 = spop %1308 }
 0x426   : > { %s885_s8 = smul.f32 0.015625, %s1309_s7  ;;  %s1311_s9 = spop %1310 }
 0x427   : > { %s907_s11 = smul.f32 0.03125, %s1311_s9 }
 0x428   : > { %s888_s15 = smul.f32 0.02, %s885_s8 }
 0x429   : > { %s1313_s16 = spop %1312  ;;  %s935_s0 = smul.f32 0.08, %s907_s11 }
 0x42a   : > { %s934_s20 = smul.f32 0.0625, %s1313_s16  ;;  %s1315_s22 = spop %1314 }
 0x42b   : > { %s956_s1 = smul.f32 0.125, %s1315_s22  ;;  %s889_s24 = sadd.f32 %s888_s15, %s836_s17 }
 0x42c   : > { %s937_s23 = smul.f32 0.08, %s934_s20  ;;  %s936_s26 = sadd.f32 %s935_s0, %s887_s21 }
 0x42d   : > { %s1317_s10 = spop %1316  ;;  %s992_s2 = smul.f32 0.32, %s956_s1 }
 0x42e   : > { %s991_s27 = smul.f32 0.25, %s1317_s10  ;;  %s938_s7 = sadd.f32 %s937_s23, %s889_s24 }
 0x42f   : > { %s993_s9 = sadd.f32 %s992_s2, %s936_s26 }
 0x430   : > { %s994_s3 = smul.f32 0.32, %s991_s27 }
 0x431   : > { %v999_v18 = vstv %s993_s9 }
 0x432   : > { %s995_s19 = sadd.f32 %s994_s3, %s938_s7 }
 0x434   : > { %v1000_v19 = vstv %s995_s19 }
 0x435   : > { %v1001_v20 = vsel %vm998_vm10, %v999_v18, %v1000_v19 }
 0x436   : > { %1002 = vst [vmem:[%s242_s28] sm:$0xff] %v1001_v20 }
 0x437 PF: > { %s15_s18 = sadd.s32 1, %s1354_s18  }
 0x438   : > { %p12_p4 = scmp.ge.s32.totalorder %s15_s18, 4  }
 0x43a   :  { %14 = sbr.rel (!%p12_p4) target bundleno = 5 (0x5), region = 73 }

</bundles_post_ra>
